<compile_context>
chip_gen: v5e
topology: v5e:2x2
jax: 0.10.0
libtpu: 0.0.40
codegen_flags: <defaults>
</compile_context>

<pallas_src>
import jax
import jax.numpy as jnp
from jax.experimental import pallas as pl
from jax.experimental.pallas import tpu as pltpu

LEAKY_SLOPE = 0.01  # torch.nn.LeakyReLU default negative_slope


def _leaky_relu(x):
    # max(x, slope*x) == LeakyReLU(x) for 0 < slope < 1.
    return jnp.maximum(x, LEAKY_SLOPE * x)


def _round_up(n, m):
    return ((n + m - 1) // m) * m


def decoder_mlp_kernel(x_ref, w1_ref, b1_ref, w2_ref, b2_ref, w3_ref, b3_ref, o_ref):
    """One batch tile of: Linear -> LeakyReLU -> Linear -> LeakyReLU -> Linear.

    x arrives as raw f32 (TM, D_in) and is cast to bf16 in vregs for the MXU;
    accumulation and biases stay f32. Hidden widths are pre-padded to 128 lanes
    (padding columns are zero, so valid outputs are exact); the final store uses
    the true, unpadded D_out width.
    """
    x = x_ref[...].astype(jnp.bfloat16)                                   # (TM, D_in)
    h1 = jnp.dot(x, w1_ref[...], preferred_element_type=jnp.float32) + b1_ref[...]
    h1 = _leaky_relu(h1).astype(jnp.bfloat16)                             # (TM, Hp)
    h2 = jnp.dot(h1, w2_ref[...], preferred_element_type=jnp.float32) + b2_ref[...]
    h2 = _leaky_relu(h2).astype(jnp.bfloat16)                             # (TM, Hp)
    y = jnp.dot(h2, w3_ref[...], preferred_element_type=jnp.float32) + b3_ref[...]
    o_ref[...] = y.astype(o_ref.dtype)                                    # (TM, D_out)


def prepare_decoder_params(params):
    """Pad hidden dims to 128 lanes and cast weights to bf16 — once, outside the
    per-call hot path. Padding rows/cols are zero, so valid outputs are exact."""
    w1, b1, w2, b2, w3, b3 = params
    d_in, h = w1.shape
    d_out = w3.shape[1]
    hp = _round_up(h, 128)

    def pad2(a, rows, cols):
        r, c = a.shape
        return jnp.pad(a, ((0, rows - r), (0, cols - c)))

    w1p = pad2(w1, d_in, hp).astype(jnp.bfloat16)   # pad output (lane) dim only
    w2p = pad2(w2, hp, hp).astype(jnp.bfloat16)
    w3p = pad2(w3, hp, d_out).astype(jnp.bfloat16)  # pad contraction dim only
    b1p = pad2(b1, 1, hp).astype(jnp.float32)
    b2p = pad2(b2, 1, hp).astype(jnp.float32)
    b3p = b3.astype(jnp.float32)                    # (1, d_out), unpadded
    return (w1p, b1p, w2p, b2p, w3p, b3p)


def anomaly_ae_forward(x, prepared_params, *, tile_m=4096):
    """Pallas AnomalyAE.forward: z = encode(x) == x ; y = decode(z).

    The encoder pass in the original forward is computed-and-discarded dead code
    (encode returns x unchanged), so it is omitted; the output is identical.
    """
    w1p, b1p, w2p, b2p, w3p, b3p = prepared_params
    B, D_in = x.shape
    assert w1p.shape[0] == D_in, "input_dim must equal bottleneck for the original forward"
    Hp = w1p.shape[1]
    D_out = w3p.shape[1]

    # Batch tile: multiple of 8 (f32 sublanes). Cap at ~B/2 so the grid has >= 2
    # steps whenever possible (engages both TensorCores on v7x) and at B so a block
    # never exceeds the array. No batch padding: pl.cdiv handles the ragged last
    # block (OOB input rows are garbage but row-independent; OOB output rows are
    # never written back).
    TM = min(tile_m, _round_up(max(-(-B // 2), 1), 8))
    TM = max(TM, 8)
    if TM > B:
        TM = B  # single full-array block (block dim == array dim is always legal)
    grid = (pl.cdiv(B, TM),)

    return pl.pallas_call(
        decoder_mlp_kernel,
        out_shape=jax.ShapeDtypeStruct((B, D_out), jnp.float32),
        grid=grid,
        in_specs=[
            pl.BlockSpec((TM, D_in), lambda i: (i, 0)),     # x: tiled over batch, raw f32
            pl.BlockSpec((D_in, Hp), lambda i: (0, 0)),     # W1: VMEM-resident
            pl.BlockSpec((1, Hp), lambda i: (0, 0)),        # b1: resident
            pl.BlockSpec((Hp, Hp), lambda i: (0, 0)),       # W2: resident
            pl.BlockSpec((1, Hp), lambda i: (0, 0)),        # b2: resident
            pl.BlockSpec((Hp, D_out), lambda i: (0, 0)),    # W3: resident
            pl.BlockSpec((1, D_out), lambda i: (0, 0)),     # b3: resident
        ],
        out_specs=pl.BlockSpec((TM, D_out), lambda i: (i, 0)),
        compiler_params=pltpu.CompilerParams(
            dimension_semantics=("parallel",),   # batch tiles shard across TCs on v7x
        ),
    )(x, w1p, b1p, w2p, b2p, w3p, b3p)


def init_decoder_params(key, bottleneck, hidden_dim, input_dim):
    """Deterministic init mimicking nn.Linear's uniform(-1/sqrt(fan_in), 1/sqrt(fan_in))."""
    def linear(k, fan_in, fan_out):
        kw, kb = jax.random.split(k)
        bound = 1.0 / jnp.sqrt(jnp.float32(fan_in))
        # Stored already transposed to [in, out]; bias as [1, out].
        w = jax.random.uniform(kw, (fan_in, fan_out), jnp.float32, -bound, bound)
        b = jax.random.uniform(kb, (1, fan_out), jnp.float32, -bound, bound)
        return w, b

    k1, k2, k3 = jax.random.split(key, 3)
    w1, b1 = linear(k1, bottleneck, hidden_dim)   # Linear(bottleneck, hidden)
    w2, b2 = linear(k2, hidden_dim, hidden_dim)   # Linear(hidden, hidden)   (no_of_layers=2)
    w3, b3 = linear(k3, hidden_dim, input_dim)    # Linear(hidden, input_dim)
    return (w1, b1, w2, b2, w3, b3)


def reference_forward(x, params):
    """Plain-JAX fp32 reference of the same forward pass (for correctness check)."""
    w1, b1, w2, b2, w3, b3 = params
    h1 = _leaky_relu(x @ w1 + b1)
    h2 = _leaky_relu(h1 @ w2 + b2)
    return h2 @ w3 + b3


if __name__ == "__main__":
    # Small shapes: input_dim == bottleneck == 32 (required for the original forward
    # to be well-formed), hidden_dim=64, no_of_layers=2.
    BOTTLENECK, HIDDEN, INPUT_DIM = 32, 64, 32

    key = jax.random.PRNGKey(0)
    kx, kx2, kx3, kp = jax.random.split(key, 4)
    raw_params = init_decoder_params(kp, BOTTLENECK, HIDDEN, INPUT_DIM)
    params = prepare_decoder_params(raw_params)   # pad/cast weights once (static)

    # Test 1: single-tile path (B=8, grid=1).
    x = jax.random.normal(kx, (8, INPUT_DIM), dtype=jnp.float32)
    y = jax.block_until_ready(anomaly_ae_forward(x, params))
    y_ref = reference_forward(x, raw_params)
    assert y.shape == (8, INPUT_DIM)
    assert jnp.allclose(y, y_ref, atol=5e-2, rtol=5e-2), "Pallas output mismatch (B=8)"

    # Test 2: multi-tile grid path (B=24, forced TM=8 -> grid of 3 tiles).
    x2 = jax.random.normal(kx2, (24, INPUT_DIM), dtype=jnp.float32)
    y2 = jax.block_until_ready(anomaly_ae_forward(x2, params, tile_m=8))
    y2_ref = reference_forward(x2, raw_params)
    assert y2.shape == (24, INPUT_DIM)
    assert jnp.allclose(y2, y2_ref, atol=5e-2, rtol=5e-2), "Pallas output mismatch (B=24, tiled)"

    # Test 3: ragged last block (B=20, default tile_m -> TM=16, grid of 2, last block 4 rows).
    x3 = jax.random.normal(kx3, (20, INPUT_DIM), dtype=jnp.float32)
    y3 = jax.block_until_ready(anomaly_ae_forward(x3, params))
    y3_ref = reference_forward(x3, raw_params)
    assert y3.shape == (20, INPUT_DIM)
    assert jnp.allclose(y3, y3_ref, atol=5e-2, rtol=5e-2), "Pallas output mismatch (B=20, ragged)"

    print("KERNEL_OK")
</pallas_src>

<mosaic_0001>
module attributes {stable_mosaic.version = 11 : i64} {
  func.func @decoder_mlp_kernel(%arg0: i32, %arg1: memref<8x32xf32, #tpu.memory_space<vmem>>, %arg2: memref<32x128xbf16, #tpu.memory_space<vmem>>, %arg3: memref<1x128xf32, #tpu.memory_space<vmem>>, %arg4: memref<128x128xbf16, #tpu.memory_space<vmem>>, %arg5: memref<1x128xf32, #tpu.memory_space<vmem>>, %arg6: memref<128x32xbf16, #tpu.memory_space<vmem>>, %arg7: memref<1x32xf32, #tpu.memory_space<vmem>>, %arg8: memref<8x32xf32, #tpu.memory_space<vmem>>) attributes {dimension_semantics = [#tpu.dimension_semantics<parallel>], iteration_bounds = array<i64: 1>, scalar_prefetch = 0 : i64, scratch_operands = 0 : i64, tpu.core_type = #tpu.core_type<tc>, window_params = [{transform_indices = @transform_0, window_bounds = array<i64: 8, 32>}, {pipeline_mode = #tpu.pipeline_mode<synchronous>, transform_indices = @transform_1, window_bounds = array<i64: 32, 128>}, {pipeline_mode = #tpu.pipeline_mode<synchronous>, transform_indices = @transform_2, window_bounds = array<i64: 1, 128>}, {pipeline_mode = #tpu.pipeline_mode<synchronous>, transform_indices = @transform_3, window_bounds = array<i64: 128, 128>}, {pipeline_mode = #tpu.pipeline_mode<synchronous>, transform_indices = @transform_4, window_bounds = array<i64: 1, 128>}, {pipeline_mode = #tpu.pipeline_mode<synchronous>, transform_indices = @transform_5, window_bounds = array<i64: 128, 32>}, {pipeline_mode = #tpu.pipeline_mode<synchronous>, transform_indices = @transform_6, window_bounds = array<i64: 1, 32>}, {transform_indices = @transform_7, window_bounds = array<i64: 8, 32>}]} {
    %c0 = arith.constant 0 : index
    %c0_0 = arith.constant 0 : index
    %0 = vector.load %arg1[%c0, %c0_0] : memref<8x32xf32, #tpu.memory_space<vmem>>, vector<8x32xf32>
    %1 = arith.truncf %0 : vector<8x32xf32> to vector<8x32xbf16>
    %c0_1 = arith.constant 0 : index
    %c0_2 = arith.constant 0 : index
    %2 = vector.load %arg2[%c0_1, %c0_2] : memref<32x128xbf16, #tpu.memory_space<vmem>>, vector<32x128xbf16>
    %cst = arith.constant dense<0.000000e+00> : vector<8x128xf32>
    %3 = tpu.matmul %1, %2, %cst {dimension_numbers = #tpu.dot_dimension_numbers<[1], [0], [0], [1], [0, 0, 1, 1], [], []>} : vector<8x32xbf16>, vector<32x128xbf16>, vector<8x128xf32> -> vector<8x128xf32>
    %c0_3 = arith.constant 0 : index
    %c0_4 = arith.constant 0 : index
    %4 = vector.load %arg3[%c0_3, %c0_4] : memref<1x128xf32, #tpu.memory_space<vmem>>, vector<1x128xf32>
    %5 = vector.broadcast %4 : vector<1x128xf32> to vector<8x128xf32>
    %6 = arith.addf %3, %5 : vector<8x128xf32>
    %cst_5 = arith.constant 0.00999999977 : f32
    %7 = vector.broadcast %cst_5 : f32 to vector<8x128xf32>
    %8 = arith.mulf %7, %6 : vector<8x128xf32>
    %9 = arith.maximumf %6, %8 : vector<8x128xf32>
    %10 = arith.truncf %9 : vector<8x128xf32> to vector<8x128xbf16>
    %c0_6 = arith.constant 0 : index
    %c0_7 = arith.constant 0 : index
    %11 = vector.load %arg4[%c0_6, %c0_7] : memref<128x128xbf16, #tpu.memory_space<vmem>>, vector<128x128xbf16>
    %cst_8 = arith.constant dense<0.000000e+00> : vector<8x128xf32>
    %12 = tpu.matmul %10, %11, %cst_8 {dimension_numbers = #tpu.dot_dimension_numbers<[1], [0], [0], [1], [0, 0, 1, 1], [], []>} : vector<8x128xbf16>, vector<128x128xbf16>, vector<8x128xf32> -> vector<8x128xf32>
    %c0_9 = arith.constant 0 : index
    %c0_10 = arith.constant 0 : index
    %13 = vector.load %arg5[%c0_9, %c0_10] : memref<1x128xf32, #tpu.memory_space<vmem>>, vector<1x128xf32>
    %14 = vector.broadcast %13 : vector<1x128xf32> to vector<8x128xf32>
    %15 = arith.addf %12, %14 : vector<8x128xf32>
    %cst_11 = arith.constant 0.00999999977 : f32
    %16 = vector.broadcast %cst_11 : f32 to vector<8x128xf32>
    %17 = arith.mulf %16, %15 : vector<8x128xf32>
    %18 = arith.maximumf %15, %17 : vector<8x128xf32>
    %19 = arith.truncf %18 : vector<8x128xf32> to vector<8x128xbf16>
    %c0_12 = arith.constant 0 : index
    %c0_13 = arith.constant 0 : index
    %20 = vector.load %arg6[%c0_12, %c0_13] : memref<128x32xbf16, #tpu.memory_space<vmem>>, vector<128x32xbf16>
    %cst_14 = arith.constant dense<0.000000e+00> : vector<8x32xf32>
    %21 = tpu.matmul %19, %20, %cst_14 {dimension_numbers = #tpu.dot_dimension_numbers<[1], [0], [0], [1], [0, 0, 1, 1], [], []>} : vector<8x128xbf16>, vector<128x32xbf16>, vector<8x32xf32> -> vector<8x32xf32>
    %c0_15 = arith.constant 0 : index
    %c0_16 = arith.constant 0 : index
    %22 = vector.load %arg7[%c0_15, %c0_16] : memref<1x32xf32, #tpu.memory_space<vmem>>, vector<1x32xf32>
    %23 = vector.broadcast %22 : vector<1x32xf32> to vector<8x32xf32>
    %24 = arith.addf %21, %23 : vector<8x32xf32>
    %c0_17 = arith.constant 0 : index
    %c0_18 = arith.constant 0 : index
    %25 = vector.load %arg8[%c0_17, %c0_18] : memref<8x32xf32, #tpu.memory_space<vmem>>, vector<8x32xf32>
    tpu.vector_store %arg8[%c0_17, %c0_18], %24 {strides = array<i32>} : memref<8x32xf32, #tpu.memory_space<vmem>>, vector<8x32xf32>,
    return
  }
  func.func @transform_0(%arg0: i32) -> (i32, i32) {
    %c0_i32 = arith.constant 0 : i32
    %c0_i32_0 = arith.constant 0 : i32
    return %arg0, %c0_i32 : i32, i32
  }
  func.func @transform_1(%arg0: i32) -> (i32, i32) {
    %c0_i32 = arith.constant 0 : i32
    %c0_i32_0 = arith.constant 0 : i32
    %c0_i32_1 = arith.constant 0 : i32
    return %c0_i32, %c0_i32_0 : i32, i32
  }
  func.func @transform_2(%arg0: i32) -> (i32, i32) {
    %c0_i32 = arith.constant 0 : i32
    %c0_i32_0 = arith.constant 0 : i32
    %c0_i32_1 = arith.constant 0 : i32
    return %c0_i32, %c0_i32_0 : i32, i32
  }
  func.func @transform_3(%arg0: i32) -> (i32, i32) {
    %c0_i32 = arith.constant 0 : i32
    %c0_i32_0 = arith.constant 0 : i32
    %c0_i32_1 = arith.constant 0 : i32
    return %c0_i32, %c0_i32_0 : i32, i32
  }
  func.func @transform_4(%arg0: i32) -> (i32, i32) {
    %c0_i32 = arith.constant 0 : i32
    %c0_i32_0 = arith.constant 0 : i32
    %c0_i32_1 = arith.constant 0 : i32
    return %c0_i32, %c0_i32_0 : i32, i32
  }
  func.func @transform_5(%arg0: i32) -> (i32, i32) {
    %c0_i32 = arith.constant 0 : i32
    %c0_i32_0 = arith.constant 0 : i32
    %c0_i32_1 = arith.constant 0 : i32
    return %c0_i32, %c0_i32_0 : i32, i32
  }
  func.func @transform_6(%arg0: i32) -> (i32, i32) {
    %c0_i32 = arith.constant 0 : i32
    %c0_i32_0 = arith.constant 0 : i32
    %c0_i32_1 = arith.constant 0 : i32
    return %c0_i32, %c0_i32_0 : i32, i32
  }
  func.func @transform_7(%arg0: i32) -> (i32, i32) {
    %c0_i32 = arith.constant 0 : i32
    %c0_i32_0 = arith.constant 0 : i32
    return %arg0, %c0_i32 : i32, i32
  }
}

</mosaic_0001>

<bundles_post_ra>
// kernel: tpu_custom_call.1
= control target key start
LH: loop header
LB: loop body
LE: loop exit
PB: predicated region body
PF: predicated region fallthrough
CT: control target
= control target key end

     0   :  { %12 = vsyncpa [#allocation3], 0  ;;  %s528_s0 = inlined_call_operand.hbm [shape: f32[8,32], index: 0, kind: input, shape index: {}]   ;;  %s529_s1 = inlined_call_operand.vmem [shape: bf16[32,128], index: 1, kind: input, shape index: {}]   ;;  %s530_s2 = inlined_call_operand.vmem [shape: f32[1,128], index: 2, kind: input, shape index: {}]   ;;  %s531_s3 = inlined_call_operand.vmem [shape: bf16[128,128], index: 3, kind: input, shape index: {}]   ;;  %s532_s4 = inlined_call_operand.vmem [shape: f32[1,128], index: 4, kind: input, shape index: {}]   ;;  %s533_s5 = inlined_call_operand.vmem [shape: bf16[128,32], index: 5, kind: input, shape index: {}]   ;;  %s534_s6 = inlined_call_operand.vmem [shape: f32[1,32], index: 6, kind: input, shape index: {}]   ;;  %s535_s7 = inlined_call_operand.hbm [shape: f32[8,32], index: 7, kind: output, shape index: {}]  }
   0x1   :  { %13 = vsyncpa [#allocation4], 0  ;;  %s19_s26 = sshll.u32 %s528_s0, 4  ;;  %s415_s27 = smov [#allocation2]   ;;  %s20_s26 = int_to_ptr.hbm [resolvable:$true] %s19_s26 }
   0x2   :  { %s21_s28 = sshll.u32 %s415_s27, 4  ;;  %s22_s28 = int_to_ptr.vmem [resolvable:$true] %s21_s28 }
   0x3   :  { %24 = dma.hbm_to_vmem [thread:$0]  %s20_s26, 128, %s22_s28, [#allocation3]  }
   0x4   :  { %411 = dma.done.wait [#allocation3], 128  }
   0x5   :  { %412 = vsyncadd [#allocation3], 4294967168  ;;  %v341_v0 = vld [vmem:[%s529_s1 + $0x8] sm:$0xff]  ;;  %v349_v1 = vld [vmem:[%s531_s3 + $0x38] sm:$0xff]  ;;  %vm64_vm0 = vcmask 261120   ;;  %s416_s19 = smov [#allocation5]  }
   0x6   :  { %74 = vmatpush.bf16.msra.mxu0 %v341_v0  ;;  %v340_v2 = vld [vmem:[%s529_s1] sm:$0xff]  ;;  %152 = vmatpush.bf16.msra.mxu1 %v349_v1  ;;  %v348_v4 = vld [vmem:[%s531_s3 + $0x30] sm:$0xff]  ;;  %v347_v6 = vld [vmem:[%s531_s3 + $0x28] sm:$0xff]  ;;  %s255_s20 = sshll.u32 %s416_s19, 4  ;;  %s257_s22 = sshll.u32 %s535_s7, 4  ;;  %s256_s20 = int_to_ptr.vmem [resolvable:$true] %s255_s20  ;;  %s258_s22 = int_to_ptr.hbm [resolvable:$true] %s257_s22 }
   0x7   :  { %v42_v3 = vld [vmem:[#allocation2] sm:$0xff]  ;;  %v345_v8 = vld [vmem:[%s531_s3 + $0x18] sm:$0xff]  ;;  %v344_v9 = vld [vmem:[%s531_s3 + $0x10] sm:$0xff] }
   0x8   :  { %v43_v5 = vpack.c.bf16 %v42_v3, %v42_v3  ;;  %v346_v7 = vld [vmem:[%s531_s3 + $0x20] sm:$0xff]  ;;  %v343_v10 = vld [vmem:[%s531_s3 + $0x8] sm:$0xff]  ;;  %v357_v12 = vld [vmem:[%s533_s5 + $0x38] sm:$0xff] }
   0x9   :  { %v342_v11 = vld [vmem:[%s531_s3] sm:$0xff]  ;;  %236 = vmatpush.bf16.msra.mxu2 %v357_v12  ;;  %v356_v13 = vld [vmem:[%s533_s5 + $0x30] sm:$0xff]  ;;  %v355_v14 = vld [vmem:[%s533_s5 + $0x28] sm:$0xff] }
   0xa   :  { %75 = vmatpush.bf16.msra.mxu0 %v340_v2  ;;  %153 = vmatpush.bf16.msra.mxu1 %v348_v4  ;;  %v354_v15 = vld [vmem:[%s533_s5 + $0x20] sm:$0xff]  ;;  %v353_v16 = vld [vmem:[%s533_s5 + $0x18] sm:$0xff]  ;;  %v352_v17 = vld [vmem:[%s533_s5 + $0x10] sm:$0xff] }
   0xb   :  { %v360_v18 = vld [vmem:[%s530_s2] ss:$0 sm:$0xff]  ;;  %v351_v25 = vld [vmem:[%s533_s5 + $0x8] sm:$0xff] }
   0xc   :  { %v350_v26 = vld [vmem:[%s533_s5] sm:$0xff] }
   0xd   :  { %275 = vmatmul.msk.bf16.vlgmr.msra.gmra.mxu0 %vm64_vm0, %v43_v5  ;;  %237 = vmatpush.bf16.msra.mxu2 %v356_v13  ;;  %v361_v27 = vld [vmem:[%s532_s4] ss:$0 sm:$0xff] }
   0xe   :  { %154 = vmatpush.bf16.msra.mxu1 %v347_v6  ;;  %v362_v34 = vld [vmem:[%s534_s6] ss:$0 sm:$0xff] }
  0x11   :  { %238 = vmatpush.bf16.msra.mxu2 %v355_v14 }
  0x12   :  { %155 = vmatpush.bf16.msra.mxu1 %v346_v7 }
  0x15   :  { %239 = vmatpush.bf16.msra.mxu2 %v354_v15 }
  0x16   :  { %156 = vmatpush.bf16.msra.mxu1 %v345_v8 }
  0x19   :  { %240 = vmatpush.bf16.msra.mxu2 %v353_v16 }
  0x1a   :  { %157 = vmatpush.bf16.msra.mxu1 %v344_v9 }
  0x1d   :  { %241 = vmatpush.bf16.msra.mxu2 %v352_v17 }
  0x1e   :  { %158 = vmatpush.bf16.msra.mxu1 %v343_v10 }
  0x21   :  { %242 = vmatpush.bf16.msra.mxu2 %v351_v25 }
  0x22   :  { %159 = vmatpush.bf16.msra.mxu1 %v342_v11 }
  0x25   :  { %243 = vmatpush.bf16.msra.mxu2 %v350_v26 }
  0x8a   :  { %v77_v19 = vpop.f32.mrf.mxu0 }
  0x8b   :  { %v78_v20 = vadd.f32 %v360_v18, %v77_v19 }
  0x8d   :  { %v81_v21 = vmul.f32 0.01, %v78_v20 }
  0x8f   :  { %v82_v22 = vmax.f32 %v78_v20, %v81_v21 }
  0x91   :  { %v83_v23 = vpack.c.bf16 %v82_v22, %v82_v22 }
  0x92   :  { %v79_v24 = vpop.f32.mrf.mxu0 }
  0x93   :  { %160 = vmatmul.bf16.vlgmr.msra.gmra.mxu1 %v83_v23 }
 0x110   :  { %v161_v28 = vpop.f32.mrf.mxu1 }
 0x111   :  { %v162_v29 = vadd.f32 %v361_v27, %v161_v28 }
 0x113   :  { %v165_v30 = vmul.f32 0.01, %v162_v29 }
 0x115   :  { %v166_v31 = vmax.f32 %v162_v29, %v165_v30 }
 0x117   :  { %v167_v32 = vpack.c.bf16 %v166_v31, %v166_v31 }
 0x118   :  { %v163_v33 = vpop.f32.mrf.mxu1 }
 0x119   :  { %244 = vmatmul.bf16.vlgmr.msra.gmra.mxu2 %v167_v32 }
 0x19c   :  { %v245_v35 = vpop.f32.mrf.mxu2 }
 0x19d   :  { %v246_v36 = vadd.f32 %v362_v34, %v245_v35 }
 0x19f   :  { %249 = vst.msk [vmem:[#allocation5] sm:$0xff] %vm64_vm0, %v246_v36 }
 0x1a0   :  { %260 = dma.vmem_to_hbm [thread:$0]  %s256_s20, 128, %s258_s22, [#allocation4]  }
 0x1a4   :  { %v247_v37 = vpop.f32.mrf.mxu2 }
 0x1a5   :  { %413 = dma.done.wait [#allocation4], 128  }
 0x1a6   :  { %414 = vsyncadd [#allocation4], 4294967168 }
 0x1a7   :  { %265 = vsyncpa [#allocation3], 1 }
 0x1a8   :  { %266 = vsyncpa [#allocation4], 1 }

</bundles_post_ra>
